<compile_context>
chip_gen: v7x
topology: tpu7x:2x2x1
jax: 0.10.0
libtpu: 0.0.40
codegen_flags: <defaults>
</compile_context>

<pallas_src>
import functools

import jax
import jax.numpy as jnp
from jax.experimental import pallas as pl
from jax.experimental.pallas import tpu as pltpu
from jax.scipy.linalg import block_diag

BN_EPS = 1e-5     # nn.BatchNorm1d default eps
COS_EPS = 1e-8    # F.cosine_similarity default eps


# ---------------------------------------------------------------------------
# Kernel 1: preprocess_image per-channel normalization (x - mean) / std.
# ---------------------------------------------------------------------------
def _normalize_kernel(x_ref, scale_ref, shift_ref, o_ref):
  # x: (C, H*W); scale/shift: (C, 1) broadcast along lanes.
  o_ref[...] = x_ref[...] * scale_ref[...] + shift_ref[...]


def preprocess_image(image, pixel_mean, pixel_std):
  """Normalize one (C, H, W) image: (x - pixel_mean) / pixel_std."""
  c, h, w = image.shape
  x2 = image.reshape(c, h * w).astype(jnp.float32)
  scale = (1.0 / pixel_std).reshape(c, 1).astype(jnp.float32)
  shift = (-pixel_mean / pixel_std).reshape(c, 1).astype(jnp.float32)
  vmem = pl.BlockSpec(memory_space=pltpu.MemorySpace.VMEM)
  out = pl.pallas_call(
      _normalize_kernel,
      out_shape=jax.ShapeDtypeStruct((c, h * w), jnp.float32),
      in_specs=[vmem, vmem, vmem],
      out_specs=vmem,
  )(x2, scale, shift)
  # TODO(synk): ImageList.from_tensors size-divisibility padding / batching is
  # data-dependent host logic and is left to the caller.
  return out.reshape(c, h, w)


# ---------------------------------------------------------------------------
# Kernel 2: fused consistency loss over all pyramid levels.
# ---------------------------------------------------------------------------
def _consistency_kernel(n, num_levels, c, hidden,
                        z0_ref, w1_ref, w2_ref, wp1_ref, wp2_ref, vec_ref,
                        loss_ref):
  rows = 2 * num_levels * n          # one row per (branch, level, sample)
  cp = num_levels * c                # packed channel width
  hp = num_levels * hidden           # packed predictor-hidden width

  # Segmented group-averaging matrix: A[i, j] = 1/n iff rows i, j belong to
  # the same BatchNorm group (n consecutive rows).  One (rows,rows)@(rows,cp)
  # MXU pass replaces the per-group slice+concat relayouts.
  rq = jax.lax.broadcasted_iota(jnp.int32, (rows, 1), 0) // n
  cq = jax.lax.broadcasted_iota(jnp.int32, (1, rows), 1) // n
  grp_avg = jnp.where(rq == cq, 1.0 / n, 0.0).astype(jnp.float32)

  def bn_relu(h, gamma, beta):
    # Training-mode BatchNorm1d: biased mean/var per (level, branch) group.
    mu = jnp.dot(grp_avg, h, preferred_element_type=jnp.float32)
    xc = h - mu
    var = jnp.dot(grp_avg, xc * xc, preferred_element_type=jnp.float32)
    return jnp.maximum(xc * jax.lax.rsqrt(var + BN_EPS) * gamma + beta, 0.0)

  # Packed bias / gamma / beta rows (one (8, cp) slab instead of 24 operands).
  vec = vec_ref[...]
  b1, g1, be1, b2 = vec[0:1, :], vec[1:2, :], vec[2:3, :], vec[3:4, :]
  bp1, gp, bep = vec[4:5, :hp], vec[5:6, :hp], vec[6:7, :hp]
  bp2 = vec[7:8, :]

  z0 = z0_ref[...]                                            # (rows, cp)

  # Head MLP (all levels in one MXU pass per layer, block-diagonal weights).
  h = jnp.dot(z0, w1_ref[...], preferred_element_type=jnp.float32) + b1
  h = bn_relu(h, g1, be1)
  zz = jnp.dot(h, w2_ref[...], preferred_element_type=jnp.float32) + b2

  # Predictor MLP.
  h = jnp.dot(zz, wp1_ref[...], preferred_element_type=jnp.float32) + bp1
  h = bn_relu(h, gp, bep)
  p = jnp.dot(h, wp2_ref[...], preferred_element_type=jnp.float32) + bp2

  # Keep only each row's own level block: broadcast biases leave constant
  # garbage in the other (dead) blocks; it never reaches the live block
  # (block-diagonal weights + per-column BN), so mask it out here once.
  row_lvl = jax.lax.broadcasted_iota(jnp.int32, (rows, 1), 0) // n
  row_lvl = row_lvl - jnp.where(row_lvl >= num_levels, num_levels, 0)
  col_blk = jax.lax.broadcasted_iota(jnp.int32, (1, cp), 1) // c
  live = row_lvl == col_blk                                   # (rows, cp)
  pm = jnp.where(live, p, 0.0)
  zm = jnp.where(live, zz, 0.0)

  # Cross-pair the two branches: rows [:half] are hres, rows [half:] are lres
  # (same per-level row layout in both halves).
  half = rows // 2
  eps2 = jnp.float32(COS_EPS * COS_EPS)

  def cos_rows(a, b):
    ab = jnp.sum(a * b, axis=-1, keepdims=True)
    an = jnp.maximum(jnp.sum(a * a, axis=-1, keepdims=True), eps2)
    bn = jnp.maximum(jnp.sum(b * b, axis=-1, keepdims=True), eps2)
    return ab * jax.lax.rsqrt(an) * jax.lax.rsqrt(bn)

  cs = cos_rows(pm[:half], zm[half:]) + cos_rows(pm[half:], zm[:half])

  # Per level: |0.5*D(p1,z2) + 0.5*D(p2,z1)|, D = -mean(cos); sum over levels.
  lvl = jax.lax.broadcasted_iota(jnp.int32, (half, 1), 0) // n
  total = jnp.float32(0.0)
  for l in range(num_levels):
    total = total + jnp.abs(jnp.sum(jnp.where(lvl == l, cs, 0.0)))
  loss_ref[0, 0] = total * jnp.float32(1.0 / (2 * n))


def consistency_loss(level_feats, level_params):
  """Fused SimSiam-style consistency loss over all pyramid levels.

  Args:
    level_feats: list of (lres_NCHW, hres_NCHW) per level.
    level_params: list of 12-tuples of per-level head/predictor parameters
      (w1, b1, g1, be1, w2, b2, wp1, bp1, gp, bep, wp2, bp2).
  Returns:
    scalar f32 consistency loss (sum over levels).
  """
  num_levels = len(level_feats)
  n, c = level_feats[0][0].shape[:2]
  hidden = level_params[0][6].shape[1]
  cp, hp = num_levels * c, num_levels * hidden
  rows = 2 * num_levels * n

  # Global average pool in plain XLA on the native NCHW layout -- the kernel
  # only ever needs the pooled (N, C) vectors, not the feature maps.
  def pool(x):
    return jnp.mean(x, axis=(2, 3), dtype=jnp.float32)

  z_h = [pool(hres) for (_, hres) in level_feats]
  z_l = [pool(lres) for (lres, _) in level_feats]

  # Block-placed activations: row group q = branch*L + level (n rows each);
  # level l's data lives in column block [l*c:(l+1)*c], zeros elsewhere.
  z0 = jnp.concatenate([block_diag(*z_h), block_diag(*z_l)], axis=0)

  f32 = lambda t: jnp.asarray(t, jnp.float32)
  # Block-diagonal per-layer weights: one MXU pass per layer for all levels.
  w1b = block_diag(*[f32(p[0]) for p in level_params])     # (cp, cp)
  w2b = block_diag(*[f32(p[4]) for p in level_params])     # (cp, cp)
  wp1b = block_diag(*[f32(p[6]) for p in level_params])    # (cp, hp)
  wp2b = block_diag(*[f32(p[10]) for p in level_params])   # (hp, cp)

  # All bias / gamma / beta vectors packed into a single (8, cp) slab.
  def cat_c(idx):
    return jnp.concatenate([f32(p[idx]) for p in level_params], axis=-1)

  def cat_h(idx):
    v = jnp.concatenate([f32(p[idx]) for p in level_params], axis=-1)
    return jnp.pad(v, ((0, 0), (0, cp - hp)))

  vec = jnp.concatenate(
      [cat_c(1), cat_c(2), cat_c(3), cat_c(5),       # b1, g1, be1, b2
       cat_h(7), cat_h(8), cat_h(9), cat_c(11)],     # bp1, gp, bep, bp2
      axis=0)                                        # (8, cp)

  args = (z0, w1b, w2b, wp1b, wp2b, vec)

  # Advisory cost estimate so XLA overlaps this tiny kernel with the big
  # external backbone / RPN / ROI compute.
  flops = 4 * rows * cp * (cp + hp)            # 4 block-diag layer matmuls
  flops += 4 * rows * rows * (cp + hp)         # BN group-stat matmuls
  transcendentals = rows * (cp + hp) + 6 * rows
  bytes_accessed = sum(int(a.size) * a.dtype.itemsize for a in args) + 4

  vmem = pl.BlockSpec(memory_space=pltpu.MemorySpace.VMEM)
  out = pl.pallas_call(
      functools.partial(_consistency_kernel, n, num_levels, c, hidden),
      out_shape=jax.ShapeDtypeStruct((1, 1), jnp.float32),
      in_specs=[vmem] * len(args),
      out_specs=pl.BlockSpec(memory_space=pltpu.MemorySpace.SMEM),
      compiler_params=pltpu.CompilerParams(
          vmem_limit_bytes=32 * 1024 * 1024),
      cost_estimate=pl.CostEstimate(
          flops=int(flops),
          transcendentals=int(transcendentals),
          bytes_accessed=int(bytes_accessed)),
  )(*args)
  return out[0, 0]


# ---------------------------------------------------------------------------
# Parameter init and pure-JAX references.
# ---------------------------------------------------------------------------
def init_level_params(key, c=256, hidden=128):
  """Deterministic PyTorch-default-style init (uniform +/- 1/sqrt(fan_in))."""
  ks = jax.random.split(key, 4)

  def lin(k, fan_in, fan_out):
    bound = 1.0 / jnp.sqrt(jnp.float32(fan_in))
    kw, kb = jax.random.split(k)
    wgt = jax.random.uniform(kw, (fan_in, fan_out), jnp.float32, -bound, bound)
    b = jax.random.uniform(kb, (1, fan_out), jnp.float32, -bound, bound)
    return wgt, b

  w1, b1 = lin(ks[0], c, c)            # head Linear(256, 256)
  w2, b2 = lin(ks[1], c, c)            # head Linear(256, 256)
  wp1, bp1 = lin(ks[2], c, hidden)     # predictor Linear(256, 128)
  wp2, bp2 = lin(ks[3], hidden, c)     # predictor Linear(128, 256)
  g1 = jnp.ones((1, c), jnp.float32)
  be1 = jnp.zeros((1, c), jnp.float32)
  gp = jnp.ones((1, hidden), jnp.float32)
  bep = jnp.zeros((1, hidden), jnp.float32)
  return (w1, b1, g1, be1, w2, b2, wp1, bp1, gp, bep, wp2, bp2)


def ref_level(lres_feat, hres_feat, params):
  """Pure-JAX reference of the same per-level consistency loss."""
  w1, b1, g1, be1, w2, b2, wp1, bp1, gp, bep, wp2, bp2 = params

  def pool(x):
    n, c, h, w = x.shape
    return x.reshape(n, c, h * w).mean(-1)

  def mlp(x, wa, ba, g, be, wb, bb):
    hdn = x @ wa + ba
    mu = hdn.mean(0, keepdims=True)
    var = ((hdn - mu) ** 2).mean(0, keepdims=True)
    hdn = (hdn - mu) / jnp.sqrt(var + BN_EPS) * g + be
    hdn = jnp.maximum(hdn, 0.0)
    return hdn @ wb + bb

  z_l, z_h = pool(lres_feat), pool(hres_feat)
  z1 = mlp(z_h, w1, b1, g1, be1, w2, b2)
  z2 = mlp(z_l, w1, b1, g1, be1, w2, b2)
  p1 = mlp(z1, wp1, bp1, gp, bep, wp2, bp2)
  p2 = mlp(z2, wp1, bp1, gp, bep, wp2, bp2)

  def neg_cos(p, z):
    pn = jnp.maximum(jnp.linalg.norm(p, axis=-1), COS_EPS)
    zn = jnp.maximum(jnp.linalg.norm(z, axis=-1), COS_EPS)
    return -jnp.mean(jnp.sum(p * z, -1) / (pn * zn))

  return jnp.abs(0.5 * neg_cos(p1, z2) + 0.5 * neg_cos(p2, z1))


if __name__ == "__main__":
  key = jax.random.PRNGKey(0)

  # --- preprocess_image normalization kernel ------------------------------
  kimg, key = jax.random.split(key)
  img = jax.random.uniform(kimg, (3, 32, 64), jnp.float32, 0.0, 255.0)
  pixel_mean = jnp.array([103.53, 116.28, 123.675], jnp.float32)
  pixel_std = jnp.array([57.375, 57.12, 58.395], jnp.float32)
  norm = jax.block_until_ready(preprocess_image(img, pixel_mean, pixel_std))
  norm_ref = (img - pixel_mean[:, None, None]) / pixel_std[:, None, None]
  assert jnp.allclose(norm, norm_ref, rtol=1e-5, atol=1e-5), "preprocess"

  # --- fused consistency-loss kernel ---------------------------------------
  N, C = 2, 256  # FPN channels = 256, matching the heads' Linear(256, ...)
  hres_hw = {4: (16, 16), 5: (8, 8), 6: (4, 4)}
  lres_hw = {4: (8, 8), 5: (4, 4), 6: (2, 2)}

  keys = jax.random.split(key, 10)
  level_params = [init_level_params(keys[p - 4]) for p in (4, 5, 6)]

  level_feats = []
  kidx = 3
  for p in (4, 5, 6):
    h, w = lres_hw[p]
    lres = jax.random.normal(keys[kidx], (N, C, h, w), jnp.float32)
    kidx += 1
    h, w = hres_hw[p]
    hres = jax.random.normal(keys[kidx], (N, C, h, w), jnp.float32)
    kidx += 1
    level_feats.append((lres, hres))

  loss = jax.block_until_ready(consistency_loss(level_feats, level_params))

  ref = jnp.sum(jnp.stack([
      ref_level(lres, hres, prm)
      for (lres, hres), prm in zip(level_feats, level_params)
  ]))
  ref = jax.block_until_ready(ref)
  assert jnp.allclose(loss, ref, rtol=2e-4, atol=2e-4), (loss, ref)

  print("KERNEL_OK")
</pallas_src>

<mosaic_0001>
module attributes {stable_mosaic.version = 11 : i64} {
  func.func @_normalize_kernel(%arg0: memref<3x2048xf32, #tpu.memory_space<vmem>>, %arg1: memref<3x1xf32, #tpu.memory_space<vmem>>, %arg2: memref<3x1xf32, #tpu.memory_space<vmem>>, %arg3: memref<3x2048xf32, #tpu.memory_space<vmem>>) attributes {dimension_semantics = [], scalar_prefetch = 0 : i64, scratch_operands = 0 : i64, tpu.core_type = #tpu.core_type<tc>} {
    %c0 = arith.constant 0 : index
    %c0_0 = arith.constant 0 : index
    %0 = vector.load %arg0[%c0, %c0_0] : memref<3x2048xf32, #tpu.memory_space<vmem>>, vector<3x2048xf32>
    %c0_1 = arith.constant 0 : index
    %c0_2 = arith.constant 0 : index
    %1 = vector.load %arg1[%c0_1, %c0_2] : memref<3x1xf32, #tpu.memory_space<vmem>>, vector<3x1xf32>
    %2 = vector.broadcast %1 : vector<3x1xf32> to vector<3x2048xf32>
    %3 = arith.mulf %0, %2 : vector<3x2048xf32>
    %c0_3 = arith.constant 0 : index
    %c0_4 = arith.constant 0 : index
    %4 = vector.load %arg2[%c0_3, %c0_4] : memref<3x1xf32, #tpu.memory_space<vmem>>, vector<3x1xf32>
    %5 = vector.broadcast %4 : vector<3x1xf32> to vector<3x2048xf32>
    %6 = arith.addf %3, %5 : vector<3x2048xf32>
    %c0_5 = arith.constant 0 : index
    %c0_6 = arith.constant 0 : index
    %7 = vector.load %arg3[%c0_5, %c0_6] : memref<3x2048xf32, #tpu.memory_space<vmem>>, vector<3x2048xf32>
    tpu.vector_store %arg3[%c0_5, %c0_6], %6 {strides = array<i32>} : memref<3x2048xf32, #tpu.memory_space<vmem>>, vector<3x2048xf32>,
    return
  }
}

</mosaic_0001>

<bundles_post_ra>
// kernel: tpu_custom_call.1
= control target key start
LH: loop header
LB: loop body
LE: loop exit
PB: predicated region body
PF: predicated region fallthrough
CT: control target
= control target key end

     0   :  { %8 = vsyncpa [#allocation3], 0  ;;  %s207_s0 = inlined_call_operand.hbm [shape: f32[3,2048], index: 0, kind: input, shape index: {}]   ;;  %s208_s1 = inlined_call_operand.vmem [shape: f32[3,1], index: 1, kind: input, shape index: {}]   ;;  %s209_s2 = inlined_call_operand.vmem [shape: f32[3,1], index: 2, kind: input, shape index: {}]   ;;  %s210_s3 = inlined_call_operand.hbm [shape: f32[3,2048], index: 3, kind: output, shape index: {}]  }
   0x1   :  { %9 = vsyncpa [#allocation4], 0  ;;  %s153_s12 = smov [#allocation2]   ;;  %s105_s16 = scalar_lea.hbm %s207_s0, 1024 }
   0x2   :  { %s16_s13 = sshll.u32 %s153_s12, 4  ;;  %p106_p0 = scmp.ne.s32.totalorder %s207_s0, %s105_s16  ;;  %s17_s13 = int_to_ptr.vmem [resolvable:$true] %s16_s13 }
   0x3   :  { %p109_p1 = scmp.lt.u32.totalorder %s105_s16, %s207_s0 }
   0x5   :  { %p111_p2 = pnand %p109_p1, %p106_p0 }
   0x7   :  { %114 = shalt.err (!%p111_p2)
}
   0x8   :  { %s115_s21 = scalar_lea.vmem %s17_s13, 1024  ;;  %p120_p4 = scmp.lt.s32.totalorder %s17_s13, %s17_s13 }
   0x9   :  { %p116_p3 = scmp.ne.s32.totalorder %s17_s13, %s115_s21  ;;  %p121_p5 = scmp.lt.s32.totalorder %s115_s21, %s115_s21 }
   0xb   :  { %p122_p6 = por %p121_p5, %p120_p4 }
   0xd   :  { %p123_p7 = pnand %p122_p6, %p116_p3 }
   0xf   :  { %126 = shalt.err (!%p123_p7)
}
  0x10   :  { %19 = dma.hbm_to_vmem [thread:$0]  %s207_s0, 1024, %s17_s13, [#allocation3]  }
  0x11   :  { %149 = dma.done.wait [#allocation3], 1024  }
  0x12   :  { %150 = vsyncadd [#allocation3], 4294966272  ;;  %v154_v0 = vmov 0   ;;  %v35_v1 = vld [vmem:[%s208_s1] sm:$0x7]  ;;  %v43_v5 = vlaneseq  ;;  %s156_s0 = smov [#allocation5]  }
  0x13   :  { %104 = vset.pattern.permute.xlu0 %v154_v0  ;;  %v56_v2 = vld [vmem:[%s209_s2] sm:$0x7]  ;;  %v155_v3 = vmov 839922192   ;;  %v28_v12 = vld [vmem:[#allocation2 + $0x8] sm:$0x77] }
  0x14   :  { %38 = vperm.xlu0 %104, %v35_v1   ;;  %v41_v4 = vunpack.c.l.s4 %v155_v3  ;;  %v44_v7 = vshrl.u32 %v43_v5, 7  ;;  %v27_v11 = vld [vmem:[#allocation2] sm:$0x77]  ;;  %v29_v13 = vld [vmem:[#allocation2 + $0x10] sm:$0x77]  ;;  %s91_s1 = sshll.u32 %s156_s0, 4  ;;  %s92_s1 = int_to_ptr.vmem [resolvable:$true] %s91_s1 }
  0x15   :  { %v30_v14 = vld [vmem:[#allocation2 + $0x18] sm:$0x77]  ;;  %v31_v15 = vld [vmem:[#allocation2 + $0x20] sm:$0x77]  ;;  %v32_v16 = vld [vmem:[#allocation2 + $0x28] sm:$0x77]  ;;  %p132_p9 = scmp.lt.s32.totalorder %s92_s1, %s92_s1 }
  0x16   :  { %v42_v6 = vunpack.c.0.s8 %v41_v4  ;;  %v33_v17 = vld [vmem:[#allocation2 + $0x30] sm:$0x77]  ;;  %v34_v18 = vld [vmem:[#allocation2 + $0x38] sm:$0x77]  ;;  %s127_s2 = scalar_lea.vmem %s92_s1, 1024 }
  0x17   :  { %p128_p8 = scmp.ne.s32.totalorder %s92_s1, %s127_s2  ;;  %p133_p10 = scmp.lt.s32.totalorder %s127_s2, %s127_s2 }
  0x18   :  { %59 = vperm.xlu0 %104, %v56_v2   ;;  %v45_v8 = vsub.s32 %v42_v6, %v44_v7 }
  0x19   :  { %p134_p11 = por %p133_p10, %p132_p9 }
  0x1b   :  { %p135_p12 = pnand %p134_p11, %p128_p8 }
  0x93   :  { %v39_v9 = vpop.permute.xlu0 %38 }
  0x94   :  { %v46_v10 = vrot.slane %v39_v9, %v45_v8 }
  0x96   :  { %v48_v20 = vmul.f32 %v46_v10, %v27_v11  ;;  %v49_v22 = vmul.f32 %v46_v10, %v28_v12  ;;  %v50_v23 = vmul.f32 %v46_v10, %v29_v13  ;;  %v51_v24 = vmul.f32 %v46_v10, %v30_v14 }
  0x97   :  { %v60_v19 = vpop.permute.xlu0 %59  ;;  %v52_v25 = vmul.f32 %v46_v10, %v31_v15  ;;  %v53_v26 = vmul.f32 %v46_v10, %v32_v16  ;;  %v54_v27 = vmul.f32 %v46_v10, %v33_v17  ;;  %v55_v28 = vmul.f32 %v46_v10, %v34_v18 }
  0x98   :  { %v67_v21 = vrot.slane %v60_v19, %v45_v8 }
  0x9a   :  { %v69_v29 = vadd.f32 %v67_v21, %v48_v20  ;;  %v70_v30 = vadd.f32 %v67_v21, %v49_v22  ;;  %v71_v31 = vadd.f32 %v67_v21, %v50_v23  ;;  %v72_v32 = vadd.f32 %v67_v21, %v51_v24 }
  0x9b   :  { %v73_v33 = vadd.f32 %v67_v21, %v52_v25  ;;  %v74_v34 = vadd.f32 %v67_v21, %v53_v26  ;;  %v75_v35 = vadd.f32 %v67_v21, %v54_v27  ;;  %v76_v36 = vadd.f32 %v67_v21, %v55_v28 }
  0x9c   :  { %77 = vst [vmem:[#allocation5] sm:$0x77] %v69_v29  ;;  %78 = vst [vmem:[#allocation5 + $0x8] sm:$0x77] %v70_v30 }
  0x9d   :  { %79 = vst [vmem:[#allocation5 + $0x10] sm:$0x77] %v71_v31  ;;  %80 = vst [vmem:[#allocation5 + $0x18] sm:$0x77] %v72_v32 }
  0x9e   :  { %81 = vst [vmem:[#allocation5 + $0x20] sm:$0x77] %v73_v33  ;;  %82 = vst [vmem:[#allocation5 + $0x28] sm:$0x77] %v74_v34 }
  0x9f   :  { %83 = vst [vmem:[#allocation5 + $0x30] sm:$0x77] %v75_v35  ;;  %84 = vst [vmem:[#allocation5 + $0x38] sm:$0x77] %v76_v36 }
  0xa0   :  { %138 = shalt.err (!%p135_p12)
}
  0xa1   :  { %s139_s30 = scalar_lea.hbm %s210_s3, 1024 }
  0xa2   :  { %p140_p13 = scmp.ne.s32.totalorder %s210_s3, %s139_s30  ;;  %p143_p0 = scmp.lt.u32.totalorder %s139_s30, %s210_s3 }
  0xa4   :  { %p145_p1 = pnand %p143_p0, %p140_p13 }
  0xa6   :  { %148 = shalt.err (!%p145_p1)
}
  0xa7   :  { %94 = dma.vmem_to_hbm [thread:$0]  %s92_s1, 1024, %s210_s3, [#allocation4]  }
  0xa8   :  { %151 = dma.done.wait [#allocation4], 1024  }
  0xa9   :  { %152 = vsyncadd [#allocation4], 4294966272 }
  0xaa   :  { %98 = vsyncpa [#allocation3], 1 }
  0xab   :  { %99 = vsyncpa [#allocation4], 1 }

</bundles_post_ra>
